<compile_context>
chip_gen: v7x
topology: tpu7x:2x2x1
jax: 0.10.0
libtpu: 0.0.40
codegen_flags: <defaults>
</compile_context>

<pallas_src>
import jax
import jax.numpy as jnp
from jax.experimental import pallas as pl
from jax.experimental.pallas import tpu as pltpu

_VREG_ELEMS = 8 * 128            # one (8,128) f32 vreg = 1024 elements
_SMALL_INPUT_BYTES = 256 << 10   # below this, plain jnp (fusable, no launch overhead)
_TARGET_STEPS = 8                # even and >=4: pipeline steady state + 2 blocks per v7x TC
_LANE_CANDIDATES = (4096, 2048, 1024, 512, 256, 128)  # lane-dense last-dim choices


def _round_up(x: int, m: int) -> int:
    return ((x + m - 1) // m) * m


def _target_block_elems() -> int:
    """Per-generation block-size cap (in elements of the f32 output buffer)."""
    try:
        kind = jax.devices()[0].device_kind.lower()
    except Exception:
        kind = ""
    if "v5 lite" in kind or "v5e" in kind or "v5lite" in kind:
        # 2 MiB/buffer: f32 in+out, double-buffered = 8 MiB, fits v5e's 16 MiB scoped VMEM.
        return 4096 * 128
    # v6e / v7x: 4 MiB/buffer (<= 16 MiB double-buffered in+out) fits 32 MiB default scoped VMEM.
    return 8192 * 128


def _ste_kernel(x_ref, o_ref):
    # (x > 0).float(): 1.0 where strictly positive, else 0.0 (NaN, -0.0 -> 0.0).
    o_ref[...] = (x_ref[...] > 0).astype(jnp.float32)


def straight_through_estimator(x: jax.Array) -> jax.Array:
    """Pallas TPU implementation of the STE forward pass: (x > 0).astype(float32)."""
    # TODO(synk): the straight-through (identity) backward pass would be added with
    # jax.custom_vjp around this forward; only the forward is implemented here.
    orig_shape = x.shape
    n = x.size
    if n == 0:
        return jnp.zeros(orig_shape, jnp.float32)

    # Small-input fallback: launch + per-step overhead dominates, and XLA can fuse the
    # compare+cast into adjacent ops, saving an entire HBM round trip.
    if n * jnp.dtype(x.dtype).itemsize < _SMALL_INPUT_BYTES:
        return (x > 0).astype(jnp.float32)

    flat = x.reshape(-1)  # metadata-only for default (contiguous) layouts
    target_block = _target_block_elems()
    compiler_params = pltpu.CompilerParams(dimension_semantics=("parallel",))

    # Preferred: lane-dense 2D view (rows, lanes), lanes a large multiple of 128.
    lanes = next((c for c in _LANE_CANDIDATES if n % c == 0), None)

    if lanes is not None:
        rows = n // lanes
        max_block_rows = max(8, (target_block // lanes) // 8 * 8)
        want_rows = _round_up(pl.cdiv(rows, _TARGET_STEPS), 8)
        block_rows = max(8, min(max_block_rows, want_rows))
        grid = (pl.cdiv(rows, block_rows),)

        out2d = pl.pallas_call(
            _ste_kernel,
            out_shape=jax.ShapeDtypeStruct((rows, lanes), jnp.float32),
            grid=grid,
            in_specs=[pl.BlockSpec((block_rows, lanes), lambda i: (i, 0))],
            out_specs=pl.BlockSpec((block_rows, lanes), lambda i: (i, 0)),
            compiler_params=compiler_params,
        )(flat.reshape(rows, lanes))
        return out2d.reshape(orig_shape)

    # Fallback: 1D path for n not divisible by 128. Block is a vreg multiple; the ragged
    # last block is masked by Pallas (padded reads feed the compare harmlessly, OOB
    # writes are dropped).
    want = _round_up(pl.cdiv(n, _TARGET_STEPS), _VREG_ELEMS)
    block = max(_VREG_ELEMS, min(target_block, want))
    grid = (pl.cdiv(n, block),)

    out_flat = pl.pallas_call(
        _ste_kernel,
        out_shape=jax.ShapeDtypeStruct((n,), jnp.float32),
        grid=grid,
        in_specs=[pl.BlockSpec((block,), lambda i: (i,))],
        out_specs=pl.BlockSpec((block,), lambda i: (i,)),
        compiler_params=compiler_params,
    )(flat)
    return out_flat.reshape(orig_shape)


def _check(x):
    out = jax.block_until_ready(straight_through_estimator(x))
    ref = (x > 0).astype(jnp.float32)
    assert out.shape == x.shape
    assert out.dtype == jnp.float32
    assert bool(jnp.all(out == ref))
    return out


if __name__ == "__main__":
    key = jax.random.PRNGKey(0)
    k0, k1, k2 = jax.random.split(key, 3)

    # 1) Small NCHW activation (typical module usage) -> fused jnp fallback path.
    x_small = jax.random.normal(k0, (2, 4, 16, 16), dtype=jnp.float32)
    _check(x_small)

    # 2) Larger NCHW activation -> Pallas lane-dense 2D path (multiple grid steps).
    x_2d = jax.random.normal(k1, (2, 4, 128, 128), dtype=jnp.float32)
    _check(x_2d)

    # 3) Ragged length (not a multiple of 128) -> Pallas 1D path with masked last block.
    x_ragged = jax.random.normal(k2, (70001,), dtype=jnp.float32)
    _check(x_ragged)

    print("KERNEL_OK")
</pallas_src>

<mosaic_0001>
module attributes {stable_mosaic.version = 11 : i64} {
  func.func @_ste_kernel(%arg0: i32, %arg1: memref<8x4096xf32, #tpu.memory_space<vmem>>, %arg2: memref<8x4096xf32, #tpu.memory_space<vmem>>) attributes {dimension_semantics = [#tpu.dimension_semantics<parallel>], iteration_bounds = array<i64: 4>, scalar_prefetch = 0 : i64, scratch_operands = 0 : i64, tpu.core_type = #tpu.core_type<tc>, window_params = [{transform_indices = @transform_0, window_bounds = array<i64: 8, 4096>}, {transform_indices = @transform_1, window_bounds = array<i64: 8, 4096>}]} {
    %c0 = arith.constant 0 : index
    %c0_0 = arith.constant 0 : index
    %0 = vector.load %arg1[%c0, %c0_0] : memref<8x4096xf32, #tpu.memory_space<vmem>>, vector<8x4096xf32>
    %cst = arith.constant 0.000000e+00 : f32
    %1 = vector.broadcast %cst : f32 to vector<8x4096xf32>
    %2 = arith.cmpf ogt, %0, %1 : vector<8x4096xf32>
    %3 = arith.extui %2 : vector<8x4096xi1> to vector<8x4096xi32>
    %4 = arith.sitofp %3 : vector<8x4096xi32> to vector<8x4096xf32>
    %c0_1 = arith.constant 0 : index
    %c0_2 = arith.constant 0 : index
    %5 = vector.load %arg2[%c0_1, %c0_2] : memref<8x4096xf32, #tpu.memory_space<vmem>>, vector<8x4096xf32>
    tpu.vector_store %arg2[%c0_1, %c0_2], %4 {strides = array<i32>} : memref<8x4096xf32, #tpu.memory_space<vmem>>, vector<8x4096xf32>,
    return
  }
  func.func @transform_0(%arg0: i32) -> (i32, i32) {
    %c0_i32 = arith.constant 0 : i32
    %c0_i32_0 = arith.constant 0 : i32
    return %arg0, %c0_i32 : i32, i32
  }
  func.func @transform_1(%arg0: i32) -> (i32, i32) {
    %c0_i32 = arith.constant 0 : i32
    %c0_i32_0 = arith.constant 0 : i32
    return %arg0, %c0_i32 : i32, i32
  }
}

</mosaic_0001>

<bundles_post_ra>
// kernel: tpu_custom_call.1
= control target key start
LH: loop header
LB: loop body
LE: loop exit
PB: predicated region body
PF: predicated region fallthrough
CT: control target
= control target key end

     0   :  { %6 = vsyncpa [#allocation3], 0  ;;  %s848_s0 = inlined_call_operand.hbm [shape: f32[32,4096], index: 0, kind: input, shape index: {}]   ;;  %s849_s1 = inlined_call_operand.hbm [shape: f32[32,4096], index: 1, kind: output, shape index: {}]  }
   0x1   :  { %8 = vsyncpa [#allocation3 + $0x1], 0 }
   0x2   :  { %9 = vsyncpa [#allocation4], 0 }
   0x3   :  { %11 = vsyncpa [#allocation4 + $0x1], 0  ;;  %s584_s6 = smov 0   ;;  %s586_s7 = smov 0  }
   0x4   :  { %s588_s8 = smov 0   ;;  %s590_s9 = smov 0  }
   0x5 LB: > { %s605_s10 = sadd.s32 4294967295, %s569_s9   ;;  %s378_s11 = sadd.s32 4294967294, %s569_s9   ;;  %s569_s9 = sphi %s590_s9, %s863_s9   ;;  %s565_s8 = sphi %s588_s8, %s862_s8   ;;  %s561_s7 = sphi %s586_s7, %s861_s7   ;;  %s557_s6 = sphi %s584_s6, %s860_s6  }
   0x6   : > { %s609_s12 = sadd.s32 1, %s569_s9   ;;  %s24_s13 = sadd.s32 1, %s565_s8 }
   0x7   : > { %s21_s14 = ssub.s32 %s569_s9, %s609_s12  ;;  %p31_p0 = scmp.ne.s32.totalorder %s565_s8, %s561_s7 }
   0x8   : > { %p22_p1 = scmp.eq.s32.totalorder %s21_s14, 0  ;;  %p32_p2 = scmp.eq.s32.totalorder %s569_s9, 0 }
   0x9   : > { %p37_p3 = scmp.ne.s32.totalorder %s561_s7, %s557_s6  ;;  %p38_p4 = scmp.eq.s32.totalorder %s605_s10, 0 }
   0xa   : > { %s621_s15 = scalar_select %p22_p1, %s565_s8, %s24_s13  }
   0xb   : > { %p623_p5 = por %p32_p2, %p31_p0  ;;  %p627_p6 = por %p38_p4, %p37_p3 }
   0xc   : > { %p61_p7 = scmp.eq.s32.totalorder %s605_s10, 3  ;;  %p67_p8 = scmp.eq.s32.totalorder %s378_s11, 3 }
   0xd   : > { %p438_p9 = scmp.lt.s32.totalorder %s569_s9, 4  ;;  %s87_s20 = sand.u32 1, %s565_s8  }
   0xe   : > { %p633_p10 = por %p61_p7, %p31_p0  ;;  %p637_p11 = por %p67_p8, %p37_p3 }
   0xf   : > { %s424_s21 = sshll.u32 %s569_s9, 12  ;;  %s381_s22 = sshll.u32 %s87_s20, 8 }
  0x10   : > { %s853_s18 = scalar_select %p633_p10, 1, 0 }
  0x11   : > { %s854_s19 = scalar_select %p637_p11, 1, 0 }
  0x12   : > { %s646_s25 = scalar_lea.hbm %s848_s0, %s424_s21  ;;  %s91_s26 = scalar_lea.vmem [#allocation2], %s381_s22 }
  0x13   : > { %s99_s27 = sshll.u32 %s91_s26, 4  ;;  %p650_p12 = pnand %p438_p9, %p623_p5  ;;  %s654_s27 = int_to_ptr.vmem [resolvable:$true] %s99_s27 }
  0x14   : > { %s88_s29 = scalar_lea.sflag [#allocation3], %s87_s20  ;;  %s473_s30 = scalar_lea.hbm %s646_s25, 4096 }
  0x15   : > { %p474_p1 = scmp.ne.s32.totalorder %s646_s25, %s473_s30  ;;  %p475_p2 = pneg %p650_p12 }
  0x16   : > { %s478_s4 = scalar_lea.hbm %s848_s0, 16384  ;;  %p479_p5 = scmp.lt.u32.totalorder %s646_s25, %s848_s0 }
  0x17   : > { %p476_p3 = pnand %p475_p2, %p474_p1  ;;  %p480_p7 = scmp.lt.u32.totalorder %s478_s4, %s473_s30 }
  0x18   : > { %p482_p9 = scmp.lt.u32.totalorder %s473_s30, %s646_s25 }
  0x19   : > { %p477_p4 = pneg %p476_p3  ;;  %p481_p8 = por %p480_p7, %p479_p5 }
  0x1b   : > { %p483_p13 = por %p482_p9, %p481_p8 }
  0x1d   : > { %p484_p0 = pnand %p483_p13, %p477_p4 }
  0x1f   : > { %487 = shalt.err (!%p484_p0)
}
  0x20   : > { %s488_s13 = scalar_lea.vmem %s654_s27, 4096  ;;  %s571_s14 = smov [#allocation2]  }
  0x21   : > { %p489_p1 = scmp.ne.s32.totalorder %s654_s27, %s488_s13  ;;  %s493_s16 = sshll.u32 %s571_s14, 4  ;;  %s494_s16 = int_to_ptr.vmem [resolvable:$false] %s493_s16 }
  0x22   : > { %s495_s20 = scalar_lea.vmem %s494_s16, 8192  ;;  %p496_p10 = scmp.lt.s32.totalorder %s654_s27, %s494_s16 }
  0x23   : > { %p491_p3 = pnand %p489_p1, %p475_p2  ;;  %p497_p5 = scmp.lt.s32.totalorder %s495_s20, %s488_s13 }
  0x25   : > { %p492_p11 = pneg %p491_p3  ;;  %p498_p7 = por %p497_p5, %p496_p10 }
  0x27   : > { %p499_p8 = pnand %p498_p7, %p492_p11 }
  0x29   : > { %502 = shalt.err (!%p499_p8)
}
  0x2a   : > { %433 = dma.hbm_to_vmem [thread:$0]  (!%p650_p12), %s646_s25, 4096, %s654_s27, %s88_s29  }
  0x2b   : > { %p856_p13 = scmp.lt.s32.totalorder %s569_s9, 5  ;;  %p857_p0 = scmp.ge.s32.totalorder %s569_s9, 1 }
  0x2d   : > { %p105_p2 = pnand %p857_p0, %p856_p13 }
  0x2e   : > { %s688_s21 = sand.u32 (!%p105_p2), 1, %s561_s7  }
  0x2f   : > { %108 = sbr.rel (%p105_p2) target bundleno = 100 (0x64), region = 24  ;;  %s385_s22 = sshll.u32 (!%p105_p2), %s688_s21, 8 }
  0x30   : > { %s111_s23 = scalar_lea.sflag (!%p105_p2), [#allocation3], %s688_s21  ;;  %s692_s24 = scalar_lea.vmem (!%p105_p2), [#allocation2], %s385_s22 }
  0x36   : > { %548 = dma.done.wait (%p627_p6), %s111_s23, 4096  }
  0x37   : > { %550 = vsyncadd (%p627_p6), %s111_s23, 4294963200  ;;  %v133_v0 = vld [vmem:[%s692_s24] sm:$0xff]  ;;  %v134_v1 = vld [vmem:[%s692_s24 + $0x8] sm:$0xff]  ;;  %s425_s25 = sshll.u32 %s605_s10, 12  ;;  %s702_s26 = scalar_lea.vmem [#allocation5], %s385_s22  ;;  %v572_v6 = vmov 0.0  }
  0x38   : > { %v135_v2 = vld [vmem:[%s692_s24 + $0x10] sm:$0xff]  ;;  %s308_s17 = sshll.u32 %s702_s26, 4  ;;  %vm165_vm0 = vcmp.gt.f32.partialorder %v133_v0, 0.0  ;;  %vm166_vm1 = vcmp.gt.f32.partialorder %v134_v1, 0.0  ;;  %v136_v3 = vld [vmem:[%s692_s24 + $0x18] sm:$0xff]  ;;  %v137_v4 = vld [vmem:[%s692_s24 + $0x20] sm:$0xff]  ;;  %s798_s29 = scalar_lea.hbm %s849_s1, %s425_s25  ;;  %s802_s17 = int_to_ptr.vmem [resolvable:$true] %s308_s17 }
  0x39   : > { %vm167_vm2 = vcmp.gt.f32.partialorder %v135_v2, 0.0  ;;  %v138_v5 = vld [vmem:[%s692_s24 + $0x28] sm:$0xff]  ;;  %v387_v7 = vsel %vm165_vm0, 1.0, %v572_v6  ;;  %v388_v8 = vsel %vm166_vm1, 1.0, %v572_v6  ;;  %vm168_vm3 = vcmp.gt.f32.partialorder %v136_v3, 0.0  ;;  %v139_v10 = vld [vmem:[%s692_s24 + $0x30] sm:$0xff] }
  0x3a   : > { %v389_v9 = vsel %vm167_vm2, 1.0, %v572_v6  ;;  %v140_v11 = vld [vmem:[%s692_s24 + $0x38] sm:$0xff]  ;;  %261 = vst [vmem:[%s702_s26] sm:$0xff] %v387_v7  ;;  %262 = vst [vmem:[%s702_s26 + $0x8] sm:$0xff] %v388_v8  ;;  %v390_v12 = vsel %vm168_vm3, 1.0, %v572_v6  ;;  %vm169_vm4 = vcmp.gt.f32.partialorder %v137_v4, 0.0  ;;  %vm170_vm5 = vcmp.gt.f32.partialorder %v138_v5, 0.0 }
  0x3b   : > { %263 = vst [vmem:[%s702_s26 + $0x10] sm:$0xff] %v389_v9  ;;  %vm171_vm6 = vcmp.gt.f32.partialorder %v139_v10, 0.0  ;;  %v141_v13 = vld [vmem:[%s692_s24 + $0x40] sm:$0xff]  ;;  %v142_v14 = vld [vmem:[%s692_s24 + $0x48] sm:$0xff]  ;;  %264 = vst [vmem:[%s702_s26 + $0x18] sm:$0xff] %v390_v12  ;;  %v391_v15 = vsel %vm169_vm4, 1.0, %v572_v6 }
  0x3c   : > { %v392_v16 = vsel %vm170_vm5, 1.0, %v572_v6  ;;  %v393_v17 = vsel %vm171_vm6, 1.0, %v572_v6  ;;  %vm172_vm7 = vcmp.gt.f32.partialorder %v140_v11, 0.0  ;;  %v143_v18 = vld [vmem:[%s692_s24 + $0x50] sm:$0xff]  ;;  %v144_v19 = vld [vmem:[%s692_s24 + $0x58] sm:$0xff]  ;;  %265 = vst [vmem:[%s702_s26 + $0x20] sm:$0xff] %v391_v15 }
  0x3d   : > { %266 = vst [vmem:[%s702_s26 + $0x28] sm:$0xff] %v392_v16  ;;  %267 = vst [vmem:[%s702_s26 + $0x30] sm:$0xff] %v393_v17  ;;  %v394_v20 = vsel %vm172_vm7, 1.0, %v572_v6  ;;  %vm173_vm8 = vcmp.gt.f32.partialorder %v141_v13, 0.0  ;;  %vm174_vm9 = vcmp.gt.f32.partialorder %v142_v14, 0.0  ;;  %vm175_vm10 = vcmp.gt.f32.partialorder %v143_v18, 0.0 }
  0x3e   : > { %v145_v21 = vld [vmem:[%s692_s24 + $0x60] sm:$0xff]  ;;  %v146_v22 = vld [vmem:[%s692_s24 + $0x68] sm:$0xff]  ;;  %268 = vst [vmem:[%s702_s26 + $0x38] sm:$0xff] %v394_v20  ;;  %v395_v23 = vsel %vm173_vm8, 1.0, %v572_v6  ;;  %v396_v24 = vsel %vm174_vm9, 1.0, %v572_v6  ;;  %v397_v25 = vsel %vm175_vm10, 1.0, %v572_v6 }
  0x3f   : > { %vm176_vm11 = vcmp.gt.f32.partialorder %v144_v19, 0.0  ;;  %v147_v26 = vld [vmem:[%s692_s24 + $0x70] sm:$0xff]  ;;  %v148_v27 = vld [vmem:[%s692_s24 + $0x78] sm:$0xff]  ;;  %269 = vst [vmem:[%s702_s26 + $0x40] sm:$0xff] %v395_v23  ;;  %270 = vst [vmem:[%s702_s26 + $0x48] sm:$0xff] %v396_v24  ;;  %vm177_vm12 = vcmp.gt.f32.partialorder %v145_v21, 0.0 }
  0x40   : > { %271 = vst [vmem:[%s702_s26 + $0x50] sm:$0xff] %v397_v25  ;;  %v398_v28 = vsel %vm176_vm11, 1.0, %v572_v6  ;;  %vm178_vm13 = vcmp.gt.f32.partialorder %v146_v22, 0.0  ;;  %vm179_vm14 = vcmp.gt.f32.partialorder %v147_v26, 0.0  ;;  %v149_v29 = vld [vmem:[%s692_s24 + $0x80] sm:$0xff]  ;;  %v150_v30 = vld [vmem:[%s692_s24 + $0x88] sm:$0xff] }
  0x41   : > { %272 = vst [vmem:[%s702_s26 + $0x58] sm:$0xff] %v398_v28  ;;  %v399_v31 = vsel %vm177_vm12, 1.0, %v572_v6  ;;  %v400_v32 = vsel %vm178_vm13, 1.0, %v572_v6  ;;  %v401_v33 = vsel %vm179_vm14, 1.0, %v572_v6  ;;  %vm180_vm15 = vcmp.gt.f32.partialorder %v148_v27, 0.0  ;;  %v151_v34 = vld [vmem:[%s692_s24 + $0x90] sm:$0xff] }
  0x42   : > { %v152_v35 = vld [vmem:[%s692_s24 + $0x98] sm:$0xff]  ;;  %273 = vst [vmem:[%s702_s26 + $0x60] sm:$0xff] %v399_v31  ;;  %274 = vst [vmem:[%s702_s26 + $0x68] sm:$0xff] %v400_v32  ;;  %v402_v36 = vsel %vm180_vm15, 1.0, %v572_v6  ;;  %vm181_vm0 = vcmp.gt.f32.partialorder %v149_v29, 0.0  ;;  %vm182_vm1 = vcmp.gt.f32.partialorder %v150_v30, 0.0 }
  0x43   : > { %275 = vst [vmem:[%s702_s26 + $0x70] sm:$0xff] %v401_v33  ;;  %vm183_vm2 = vcmp.gt.f32.partialorder %v151_v34, 0.0  ;;  %v153_v37 = vld [vmem:[%s692_s24 + $0xa0] sm:$0xff]  ;;  %v154_v38 = vld [vmem:[%s692_s24 + $0xa8] sm:$0xff]  ;;  %276 = vst [vmem:[%s702_s26 + $0x78] sm:$0xff] %v402_v36  ;;  %v403_v39 = vsel %vm181_vm0, 1.0, %v572_v6 }
  0x44   : > { %v404_v40 = vsel %vm182_vm1, 1.0, %v572_v6  ;;  %v405_v41 = vsel %vm183_vm2, 1.0, %v572_v6  ;;  %vm184_vm3 = vcmp.gt.f32.partialorder %v152_v35, 0.0  ;;  %v155_v42 = vld [vmem:[%s692_s24 + $0xb0] sm:$0xff]  ;;  %v156_v43 = vld [vmem:[%s692_s24 + $0xb8] sm:$0xff]  ;;  %277 = vst [vmem:[%s702_s26 + $0x80] sm:$0xff] %v403_v39 }
  0x45   : > { %278 = vst [vmem:[%s702_s26 + $0x88] sm:$0xff] %v404_v40  ;;  %279 = vst [vmem:[%s702_s26 + $0x90] sm:$0xff] %v405_v41  ;;  %v406_v44 = vsel %vm184_vm3, 1.0, %v572_v6  ;;  %vm185_vm4 = vcmp.gt.f32.partialorder %v153_v37, 0.0  ;;  %vm186_vm5 = vcmp.gt.f32.partialorder %v154_v38, 0.0  ;;  %vm187_vm6 = vcmp.gt.f32.partialorder %v155_v42, 0.0 }
  0x46   : > { %v157_v45 = vld [vmem:[%s692_s24 + $0xc0] sm:$0xff]  ;;  %v158_v46 = vld [vmem:[%s692_s24 + $0xc8] sm:$0xff]  ;;  %280 = vst [vmem:[%s702_s26 + $0x98] sm:$0xff] %v406_v44  ;;  %v407_v47 = vsel %vm185_vm4, 1.0, %v572_v6  ;;  %v408_v48 = vsel %vm186_vm5, 1.0, %v572_v6  ;;  %v409_v49 = vsel %vm187_vm6, 1.0, %v572_v6 }
  0x47   : > { %vm188_vm7 = vcmp.gt.f32.partialorder %v156_v43, 0.0  ;;  %v159_v50 = vld [vmem:[%s692_s24 + $0xd0] sm:$0xff]  ;;  %v160_v51 = vld [vmem:[%s692_s24 + $0xd8] sm:$0xff]  ;;  %281 = vst [vmem:[%s702_s26 + $0xa0] sm:$0xff] %v407_v47  ;;  %282 = vst [vmem:[%s702_s26 + $0xa8] sm:$0xff] %v408_v48  ;;  %vm189_vm8 = vcmp.gt.f32.partialorder %v157_v45, 0.0 }
  0x48   : > { %283 = vst [vmem:[%s702_s26 + $0xb0] sm:$0xff] %v409_v49  ;;  %v410_v52 = vsel %vm188_vm7, 1.0, %v572_v6  ;;  %vm190_vm9 = vcmp.gt.f32.partialorder %v158_v46, 0.0  ;;  %vm191_vm10 = vcmp.gt.f32.partialorder %v159_v50, 0.0  ;;  %v161_v53 = vld [vmem:[%s692_s24 + $0xe0] sm:$0xff]  ;;  %v162_v54 = vld [vmem:[%s692_s24 + $0xe8] sm:$0xff] }
  0x49   : > { %284 = vst [vmem:[%s702_s26 + $0xb8] sm:$0xff] %v410_v52  ;;  %v411_v55 = vsel %vm189_vm8, 1.0, %v572_v6  ;;  %v412_v56 = vsel %vm190_vm9, 1.0, %v572_v6  ;;  %v413_v57 = vsel %vm191_vm10, 1.0, %v572_v6  ;;  %vm192_vm11 = vcmp.gt.f32.partialorder %v160_v51, 0.0  ;;  %v163_v58 = vld [vmem:[%s692_s24 + $0xf0] sm:$0xff] }
  0x4a   : > { %v164_v59 = vld [vmem:[%s692_s24 + $0xf8] sm:$0xff]  ;;  %285 = vst [vmem:[%s702_s26 + $0xc0] sm:$0xff] %v411_v55  ;;  %286 = vst [vmem:[%s702_s26 + $0xc8] sm:$0xff] %v412_v56  ;;  %v414_v60 = vsel %vm192_vm11, 1.0, %v572_v6  ;;  %vm193_vm12 = vcmp.gt.f32.partialorder %v161_v53, 0.0  ;;  %vm194_vm13 = vcmp.gt.f32.partialorder %v162_v54, 0.0 }
  0x4b   : > { %287 = vst [vmem:[%s702_s26 + $0xd0] sm:$0xff] %v413_v57  ;;  %vm195_vm14 = vcmp.gt.f32.partialorder %v163_v58, 0.0  ;;  %288 = vst [vmem:[%s702_s26 + $0xd8] sm:$0xff] %v414_v60  ;;  %v415_v61 = vsel %vm193_vm12, 1.0, %v572_v6  ;;  %v416_v62 = vsel %vm194_vm13, 1.0, %v572_v6  ;;  %vm196_vm15 = vcmp.gt.f32.partialorder %v164_v59, 0.0 }
  0x4c   : > { %v417_v63 = vsel %vm195_vm14, 1.0, %v572_v6  ;;  %289 = vst [vmem:[%s702_s26 + $0xe0] sm:$0xff] %v415_v61  ;;  %290 = vst [vmem:[%s702_s26 + $0xe8] sm:$0xff] %v416_v62  ;;  %v418_v0 = vsel %vm196_vm15, 1.0, %v572_v6  ;;  %s294_s30 = scalar_lea.sflag [#allocation4], %s688_s21  ;;  %s503_s2 = scalar_lea.vmem %s802_s17, 4096 }
  0x4d   : > { %291 = vst [vmem:[%s702_s26 + $0xf0] sm:$0xff] %v417_v63  ;;  %292 = vst [vmem:[%s702_s26 + $0xf8] sm:$0xff] %v418_v0  ;;  %p504_p6 = scmp.ne.s32.totalorder %s802_s17, %s503_s2  ;;  %p858_p10 = scmp.ne.s32.totalorder %s853_s18, 0 }
  0x4e   : > { %s573_s10 = smov [#allocation5]  }
  0x4f   : > { %p505_p11 = pnand %p504_p6, %p858_p10  ;;  %s507_s3 = sshll.u32 %s573_s10, 4  ;;  %s508_s3 = int_to_ptr.vmem [resolvable:$false] %s507_s3 }
  0x50   : > { %s509_s4 = scalar_lea.vmem %s508_s3, 8192  ;;  %p510_p4 = scmp.lt.s32.totalorder %s802_s17, %s508_s3 }
  0x51   : > { %p506_p12 = pneg %p505_p11  ;;  %p511_p9 = scmp.lt.s32.totalorder %s509_s4, %s503_s2 }
  0x53   : > { %p512_p1 = por %p511_p9, %p510_p4 }
  0x55   : > { %p513_p3 = pnand %p512_p1, %p506_p12 }
  0x57   : > { %516 = shalt.err (!%p513_p3)
}
  0x58   : > { %s517_s5 = scalar_lea.hbm %s798_s29, 4096  ;;  %s521_s14 = scalar_lea.hbm %s849_s1, 16384 }
  0x59   : > { %p518_p5 = scmp.ne.s32.totalorder %s798_s29, %s517_s5  ;;  %p522_p13 = scmp.lt.u32.totalorder %s798_s29, %s849_s1 }
  0x5a   : > { %p523_p0 = scmp.lt.u32.totalorder %s521_s14, %s517_s5  ;;  %p525_p6 = scmp.lt.u32.totalorder %s517_s5, %s798_s29 }
  0x5b   : > { %p519_p7 = pnand %p518_p5, %p858_p10 }
  0x5c   : > { %p524_p2 = por %p523_p0, %p522_p13 }
  0x5d   : > { %p520_p8 = pneg %p519_p7 }
  0x5e   : > { %p526_p11 = por %p525_p6, %p524_p2 }
  0x60   : > { %p527_p12 = pnand %p526_p11, %p520_p8 }
  0x62   : > { %530 = shalt.err (!%p527_p12)
}
  0x63   : > { %428 = dma.vmem_to_hbm [thread:$0]  (%p858_p10), %s802_s17, 4096, %s798_s29, %s294_s30  }
  0x64 PF: > { %p439_p4 = scmp.ge.s32.totalorder %s569_s9, 2  ;;  %s320_s21 = sand.u32 1, %s557_s6  }
  0x65   : > { %p859_p9 = scmp.ne.s32.totalorder %s854_s19, 0  ;;  %s321_s22 = scalar_lea.sflag [#allocation4], %s320_s21 }
  0x67   : > { %p435_p1 = pnand %p439_p4, %p859_p9 }
  0x69   : > { %552 = dma.done.wait (!%p435_p1), %s321_s22, 4096  }
  0x6a   : > { %554 = vsyncadd (!%p435_p1), %s321_s22, 4294963200  ;;  %p14_p3 = scmp.ge.s32.totalorder %s609_s12, 6   ;;  %s860_s6 = smov %s561_s7 }
  0x6b   : > { %s861_s7 = smov %s565_s8  ;;  %s862_s8 = smov %s621_s15 }
  0x6c   : > { %s863_s9 = smov %s609_s12  ;;  %16 = sbr.rel (!%p14_p3) target bundleno = 5 (0x5), region = 69 }
  0x73   :  { %326 = vsyncpa [#allocation3], 1 }
  0x74   :  { %328 = vsyncpa [#allocation3 + $0x1], 1 }
  0x75   :  { %329 = vsyncpa [#allocation4], 1 }
  0x76   :  { %331 = vsyncpa [#allocation4 + $0x1], 1 }

</bundles_post_ra>
